<compile_context>
chip_gen: v7x
topology: tpu7x:2x2x1
jax: 0.10.0
libtpu: 0.0.40
codegen_flags: <defaults>
</compile_context>

<pallas_src>
import functools
import math

import jax
import jax.numpy as jnp
from jax.experimental import pallas as pl
from jax.experimental.pallas import tpu as pltpu

NONLINEARITY = 0.1
A_CONST = 50.0 * NONLINEARITY / (1.0 - NONLINEARITY)    # DendriteandDD.a ~= 5.556
INV_EXP_A_M1 = 1.0 / (math.exp(A_CONST) - 1.0)          # 1/(e^a - 1), compile-time
SOMA_THRESHOLD = 0.11                                   # Soma.threshold
LANE = 128


def _layer_kernel(x_ref, w_ref, dd_ref, out_ref):
    """Entire Layer.forward in one invocation.

    x_ref : (S*B, S*IN)  block-diagonal stacked split inputs
    w_ref : (S*IN, Cp)   packed per-split Linear weights (pre-transposed, padded)
    dd_ref: (Cp, Cp)     ddNet weight, pre-transposed + lane-padded
    out_ref:(B, Cp)      Soma output (padded channels sliced off outside)
    """
    x = x_ref[...]                                    # (S*B, S*IN)
    w = w_ref[...]                                    # (S*IN, Cp)
    ddw_t = dd_ref[...]                               # (Cp, Cp)

    b = out_ref.shape[0]
    n_split = x_ref.shape[0] // b                     # compile-time constant

    # All S per-split nn.Linear(bias=False) layers in a single MXU matmul.
    h = jnp.dot(x, w, preferred_element_type=jnp.float32)            # (S*B, Cp)

    # ---- DendriteandDD (rows of the fused tensor are independent) ----
    # NOTE: an all-zero row gives hmax == 0 -> NaN, exactly like the PyTorch
    # reference (which also divides by zero); not guarded on purpose.
    hmax = jnp.max(jnp.abs(h), axis=1, keepdims=True)                 # (S*B, 1)
    h = h / hmax                                                      # exact div
    c = (jnp.exp(A_CONST * h) - 1.0) * INV_EXP_A_M1

    # ddNet: x = (x @ Wdd^T) * c, applied twice (Wdd already transposed).
    t = jnp.dot(c, ddw_t, preferred_element_type=jnp.float32) * c
    t = jnp.dot(t, ddw_t, preferred_element_type=jnp.float32) * c

    tmax = jnp.max(jnp.abs(t), axis=1, keepdims=True)
    d = t / tmax                                                      # (S*B, Cp)

    # ---- Sum the per-split dendrite outputs (static sublane slices) ----
    acc = d[0:b]
    for s in range(1, n_split):
        acc = acc + d[s * b:(s + 1) * b]

    # ---- Soma: clamp(2*sigmoid(z) - 1, min=0) == clamp(tanh(z/2), min=0) ----
    z = acc - SOMA_THRESHOLD
    out_ref[...] = jnp.maximum(jnp.tanh(0.5 * z), 0.0).astype(out_ref.dtype)


def prepare_params(w_stacked, dd_w):
    """One-time (init-time) weight packing; keep the results cached.

    w_stacked: (S, C, IN) torch Linear layout; dd_w: (C, C).
    Returns w_pack (S*IN, Cp) and ddw_t (Cp, Cp), both zero-padded on the
    channel dim so the kernel's vregs are lane-dense.
    """
    s, c, in_dim = w_stacked.shape
    cp = max(LANE, ((c + LANE - 1) // LANE) * LANE)
    w_t = jnp.transpose(w_stacked, (0, 2, 1)).reshape(s * in_dim, c)  # (S*IN, C)
    w_pack = jnp.pad(w_t, ((0, 0), (0, cp - c)))                      # (S*IN, Cp)
    ddw_t = jnp.pad(dd_w.T, ((0, cp - c), (0, cp - c)))               # (Cp, Cp)
    return w_pack, ddw_t


@functools.partial(jax.jit, static_argnames=("out_channels",))
def layer_forward(x_stacked, w_pack, ddw_t, *, out_channels):
    """x_stacked: (S, B, IN); w_pack/ddw_t from prepare_params. Returns (B, C)."""
    s, b, in_dim = x_stacked.shape
    cp = ddw_t.shape[0]

    # Block-diagonal LHS so one matmul computes all S independent Linears.
    zero = jnp.zeros((b, in_dim), x_stacked.dtype)
    row_blocks = []
    for i in range(s):
        parts = [x_stacked[i] if j == i else zero for j in range(s)]
        row_blocks.append(jnp.concatenate(parts, axis=1))
    x_bd = jnp.concatenate(row_blocks, axis=0)                        # (S*B, S*IN)

    out = pl.pallas_call(
        _layer_kernel,
        out_shape=jax.ShapeDtypeStruct((b, cp), jnp.float32),
        grid=(1,),                                    # single invocation, ~90 KB
        in_specs=[
            pl.BlockSpec((s * b, s * in_dim), lambda i: (0, 0)),
            pl.BlockSpec((s * in_dim, cp), lambda i: (0, 0)),
            pl.BlockSpec((cp, cp), lambda i: (0, 0)),
        ],
        out_specs=pl.BlockSpec((b, cp), lambda i: (0, 0)),
        compiler_params=pltpu.CompilerParams(
            dimension_semantics=("arbitrary",),
        ),
    )(x_bd, w_pack, ddw_t)
    return out[:, :out_channels]                      # fuses under jit


def reference_forward(x_stacked, w_stacked, dd_w):
    """Pure-JAX reference mirroring the PyTorch module (unpadded, unfused)."""
    def dendrite(h):
        hmax = jnp.max(jnp.abs(h), axis=1, keepdims=True)
        h = h / hmax
        c = (jnp.exp(A_CONST * h) - 1.0) / (jnp.exp(A_CONST) - 1.0)
        t = c
        for _ in range(2):
            t = (t @ dd_w.T) * c
        tmax = jnp.max(jnp.abs(t), axis=1, keepdims=True)
        return t / tmax

    acc = None
    for i in range(x_stacked.shape[0]):
        h = x_stacked[i] @ w_stacked[i].T
        d = dendrite(h)
        acc = d if acc is None else acc + d
    y = 2.0 * jax.nn.sigmoid(acc - SOMA_THRESHOLD) - 1.0
    return jnp.maximum(y, 0.0)


if __name__ == "__main__":
    # Small shapes consistent with the module: two splits of 16 input
    # features each, out_channel = 32, batch = 8.
    S, B, IN, C = 2, 8, 16, 32

    key = jax.random.PRNGKey(0)
    k_x, k_w, k_dd = jax.random.split(key, 3)

    # Deterministic synthetic parameters (torch Linear layout: (out, in)).
    x_stacked = jax.random.normal(k_x, (S, B, IN), dtype=jnp.float32)
    w_stacked = (jax.random.uniform(k_w, (S, C, IN), dtype=jnp.float32) - 0.5) * (
        2.0 / jnp.sqrt(IN)
    )
    dd_w = (jax.random.uniform(k_dd, (C, C), dtype=jnp.float32) - 0.5) * (
        2.0 / jnp.sqrt(C)
    )

    # One-time weight packing (init-time, not in the forward path).
    w_pack, ddw_t = prepare_params(w_stacked, dd_w)
    w_pack = jax.block_until_ready(w_pack)
    ddw_t = jax.block_until_ready(ddw_t)

    out = layer_forward(x_stacked, w_pack, ddw_t, out_channels=C)
    out = jax.block_until_ready(out)

    ref = reference_forward(x_stacked, w_stacked, dd_w)
    assert out.shape == (B, C)
    # Exact divides + tanh epilogue: tolerance tightened from 1e-2 to 1e-4
    # (observed error is at f32 rounding level).
    assert jnp.allclose(out, ref, atol=1e-4, rtol=1e-3), "mismatch vs JAX reference"

    print("KERNEL_OK")
</pallas_src>

<mosaic_0001>
module attributes {stable_mosaic.version = 11 : i64} {
  func.func @_layer_kernel(%arg0: i32, %arg1: memref<16x32xf32, #tpu.memory_space<vmem>>, %arg2: memref<32x128xf32, #tpu.memory_space<vmem>>, %arg3: memref<128x128xf32, #tpu.memory_space<vmem>>, %arg4: memref<8x128xf32, #tpu.memory_space<vmem>>) attributes {dimension_semantics = [#tpu.dimension_semantics<arbitrary>], iteration_bounds = array<i64: 1>, scalar_prefetch = 0 : i64, scratch_operands = 0 : i64, tpu.core_type = #tpu.core_type<tc>, window_params = [{pipeline_mode = #tpu.pipeline_mode<synchronous>, transform_indices = @transform_0, window_bounds = array<i64: 16, 32>}, {pipeline_mode = #tpu.pipeline_mode<synchronous>, transform_indices = @transform_1, window_bounds = array<i64: 32, 128>}, {pipeline_mode = #tpu.pipeline_mode<synchronous>, transform_indices = @transform_2, window_bounds = array<i64: 128, 128>}, {pipeline_mode = #tpu.pipeline_mode<synchronous>, transform_indices = @transform_3, window_bounds = array<i64: 8, 128>}]} {
    %c0 = arith.constant 0 : index
    %c0_0 = arith.constant 0 : index
    %0 = vector.load %arg1[%c0, %c0_0] : memref<16x32xf32, #tpu.memory_space<vmem>>, vector<16x32xf32>
    %c0_1 = arith.constant 0 : index
    %c0_2 = arith.constant 0 : index
    %1 = vector.load %arg2[%c0_1, %c0_2] : memref<32x128xf32, #tpu.memory_space<vmem>>, vector<32x128xf32>
    %c0_3 = arith.constant 0 : index
    %c0_4 = arith.constant 0 : index
    %2 = vector.load %arg3[%c0_3, %c0_4] : memref<128x128xf32, #tpu.memory_space<vmem>>, vector<128x128xf32>
    %cst = arith.constant dense<0.000000e+00> : vector<16x128xf32>
    %3 = tpu.matmul %0, %1, %cst {dimension_numbers = #tpu.dot_dimension_numbers<[1], [0], [0], [1], [0, 0, 1, 1], [], []>} : vector<16x32xf32>, vector<32x128xf32>, vector<16x128xf32> -> vector<16x128xf32>
    %4 = math.absf %3 : vector<16x128xf32>
    %cst_5 = arith.constant dense<0xFF800000> : vector<16xf32>
    %5 = vector.multi_reduction <maximumf>, %4, %cst_5 [1] : vector<16x128xf32> to vector<16xf32>
    %6 = vector.shape_cast %5 : vector<16xf32> to vector<16x1xf32>
    %7 = vector.broadcast %6 : vector<16x1xf32> to vector<16x128xf32>
    %8 = arith.divf %3, %7 : vector<16x128xf32>
    %cst_6 = arith.constant 5.55555534 : f32
    %9 = vector.broadcast %cst_6 : f32 to vector<16x128xf32>
    %10 = arith.mulf %9, %8 : vector<16x128xf32>
    %11 = math.exp %10 : vector<16x128xf32>
    %cst_7 = arith.constant 1.000000e+00 : f32
    %12 = vector.broadcast %cst_7 : f32 to vector<16x128xf32>
    %13 = arith.subf %11, %12 : vector<16x128xf32>
    %cst_8 = arith.constant 0.00388092338 : f32
    %14 = vector.broadcast %cst_8 : f32 to vector<16x128xf32>
    %15 = arith.mulf %13, %14 : vector<16x128xf32>
    %cst_9 = arith.constant dense<0.000000e+00> : vector<16x128xf32>
    %16 = tpu.matmul %15, %2, %cst_9 {dimension_numbers = #tpu.dot_dimension_numbers<[1], [0], [0], [1], [0, 0, 1, 1], [], []>} : vector<16x128xf32>, vector<128x128xf32>, vector<16x128xf32> -> vector<16x128xf32>
    %17 = arith.mulf %16, %15 : vector<16x128xf32>
    %cst_10 = arith.constant dense<0.000000e+00> : vector<16x128xf32>
    %18 = tpu.matmul %17, %2, %cst_10 {dimension_numbers = #tpu.dot_dimension_numbers<[1], [0], [0], [1], [0, 0, 1, 1], [], []>} : vector<16x128xf32>, vector<128x128xf32>, vector<16x128xf32> -> vector<16x128xf32>
    %19 = arith.mulf %18, %15 : vector<16x128xf32>
    %20 = math.absf %19 : vector<16x128xf32>
    %cst_11 = arith.constant dense<0xFF800000> : vector<16xf32>
    %21 = vector.multi_reduction <maximumf>, %20, %cst_11 [1] : vector<16x128xf32> to vector<16xf32>
    %22 = vector.shape_cast %21 : vector<16xf32> to vector<16x1xf32>
    %23 = vector.broadcast %22 : vector<16x1xf32> to vector<16x128xf32>
    %24 = arith.divf %19, %23 : vector<16x128xf32>
    %25 = vector.extract_strided_slice %24 {offsets = [0, 0], sizes = [8, 128], strides = [1, 1]} : vector<16x128xf32> to vector<8x128xf32>
    %26 = vector.extract_strided_slice %24 {offsets = [8, 0], sizes = [8, 128], strides = [1, 1]} : vector<16x128xf32> to vector<8x128xf32>
    %27 = arith.addf %25, %26 : vector<8x128xf32>
    %cst_12 = arith.constant 1.100000e-01 : f32
    %28 = vector.broadcast %cst_12 : f32 to vector<8x128xf32>
    %29 = arith.subf %27, %28 : vector<8x128xf32>
    %cst_13 = arith.constant 5.000000e-01 : f32
    %30 = vector.broadcast %cst_13 : f32 to vector<8x128xf32>
    %31 = arith.mulf %30, %29 : vector<8x128xf32>
    %32 = math.tanh %31 : vector<8x128xf32>
    %cst_14 = arith.constant 0.000000e+00 : f32
    %33 = vector.broadcast %cst_14 : f32 to vector<8x128xf32>
    %34 = arith.maximumf %32, %33 : vector<8x128xf32>
    %c0_15 = arith.constant 0 : index
    %c0_16 = arith.constant 0 : index
    %35 = vector.load %arg4[%c0_15, %c0_16] : memref<8x128xf32, #tpu.memory_space<vmem>>, vector<8x128xf32>
    tpu.vector_store %arg4[%c0_15, %c0_16], %34 {strides = array<i32>} : memref<8x128xf32, #tpu.memory_space<vmem>>, vector<8x128xf32>,
    return
  }
  func.func @transform_0(%arg0: i32) -> (i32, i32) {
    %c0_i32 = arith.constant 0 : i32
    %c0_i32_0 = arith.constant 0 : i32
    %c0_i32_1 = arith.constant 0 : i32
    return %c0_i32, %c0_i32_0 : i32, i32
  }
  func.func @transform_1(%arg0: i32) -> (i32, i32) {
    %c0_i32 = arith.constant 0 : i32
    %c0_i32_0 = arith.constant 0 : i32
    %c0_i32_1 = arith.constant 0 : i32
    return %c0_i32, %c0_i32_0 : i32, i32
  }
  func.func @transform_2(%arg0: i32) -> (i32, i32) {
    %c0_i32 = arith.constant 0 : i32
    %c0_i32_0 = arith.constant 0 : i32
    %c0_i32_1 = arith.constant 0 : i32
    return %c0_i32, %c0_i32_0 : i32, i32
  }
  func.func @transform_3(%arg0: i32) -> (i32, i32) {
    %c0_i32 = arith.constant 0 : i32
    %c0_i32_0 = arith.constant 0 : i32
    %c0_i32_1 = arith.constant 0 : i32
    return %c0_i32, %c0_i32_0 : i32, i32
  }
}

</mosaic_0001>

<bundles_post_ra>
// kernel: layer_forward.1
= control target key start
LH: loop header
LB: loop body
LE: loop exit
PB: predicated region body
PF: predicated region fallthrough
CT: control target
= control target key end

     0   :  { %8 = vsyncpa [#allocation3], 0  ;;  %s678_s0 = inlined_call_operand.vmem [shape: f32[16,32], index: 0, kind: input, shape index: {}]   ;;  %s679_s1 = inlined_call_operand.vmem [shape: f32[32,128], index: 1, kind: input, shape index: {}]   ;;  %s680_s2 = inlined_call_operand.hbm [shape: f32[128,128], index: 2, kind: input, shape index: {}]   ;;  %s681_s3 = inlined_call_operand.hbm [shape: f32[8,128], index: 3, kind: output, shape index: {}]  }
   0x1   :  { %9 = vsyncpa [#allocation4], 0  ;;  %s604_s12 = smov [#allocation2]   ;;  %s556_s16 = scalar_lea.hbm %s680_s2, 2048 }
   0x2   :  { %s19_s13 = sshll.u32 %s604_s12, 4  ;;  %p557_p0 = scmp.ne.s32.totalorder %s680_s2, %s556_s16  ;;  %s20_s13 = int_to_ptr.vmem [resolvable:$true] %s19_s13 }
   0x3   :  { %p560_p1 = scmp.lt.u32.totalorder %s556_s16, %s680_s2 }
   0x5   :  { %p562_p2 = pnand %p560_p1, %p557_p0 }
   0x7   :  { %565 = shalt.err (!%p562_p2)
}
   0x8   :  { %s566_s21 = scalar_lea.vmem %s20_s13, 2048  ;;  %p571_p4 = scmp.lt.s32.totalorder %s20_s13, %s20_s13 }
   0x9   :  { %p567_p3 = scmp.ne.s32.totalorder %s20_s13, %s566_s21  ;;  %p572_p5 = scmp.lt.s32.totalorder %s566_s21, %s566_s21 }
   0xb   :  { %p573_p6 = por %p572_p5, %p571_p4 }
   0xd   :  { %p574_p7 = pnand %p573_p6, %p567_p3 }
   0xf   :  { %577 = shalt.err (!%p574_p7)
}
  0x10   :  { %s605_s22 = smov 128   ;;  %s606_s23 = smov 8  }
  0x11   :  { %25 = dma.hbm_to_vmem [thread:$0]  %s680_s2, 2048, %s20_s13, [#allocation3], %s605_s22, %s605_s22, %s606_s23  }
  0x12   :  { %600 = dma.done.wait [#allocation3], 2048  }
  0x13   :  { %601 = vsyncadd [#allocation3], 4294965248  ;;  %vm51_vm0 = vcmask 261120   ;;  %v31_v0 = vld [vmem:[%s679_s1] sm:$0xff]  ;;  %v32_v1 = vld [vmem:[%s679_s1 + $0x8] sm:$0xff] }
  0x14   :  { %v33_v2 = vld [vmem:[%s679_s1 + $0x10] sm:$0xff]  ;;  %v466_v3 = vpack.c.bf16 %v32_v1, %v31_v0  ;;  %v34_v4 = vld [vmem:[%s679_s1 + $0x18] sm:$0xff]  ;;  %v29_v5 = vld [vmem:[%s678_s0] sm:$0xff] }
  0x15   :  { %v470_v6 = vpack.c.bf16 %v34_v4, %v33_v2  ;;  %393 = vmatprep.mubr.msk.f32.mxu0 %vm51_vm0, %v29_v5  ;;  %v30_v7 = vld [vmem:[%s678_s0 + $0x8] sm:$0xff]  ;;  %v35_v12 = vld [vmem:[#allocation2] sm:$0xff]  ;;  %v37_v15 = vld [vmem:[#allocation2 + $0x10] sm:$0xff]  ;;  %s607_s0 = smov [#allocation5]  }
  0x16   :  { %467 = vmatprep.subr.bf16.mxu0 %v466_v3  ;;  %v36_v13 = vld [vmem:[#allocation2 + $0x8] sm:$0xff]  ;;  %v38_v16 = vld [vmem:[#allocation2 + $0x18] sm:$0xff]  ;;  %v39_v17 = vld [vmem:[#allocation2 + $0x20] sm:$0xff]  ;;  %s329_s1 = sshll.u32 %s607_s0, 4  ;;  %s330_s1 = int_to_ptr.vmem [resolvable:$true] %s329_s1 }
  0x17   :  { %469 = vmatpush3.bf16.msra.mxu0 %v466_v3  ;;  %v474_v14 = vpack.c.bf16 %v36_v13, %v35_v12  ;;  %v478_v18 = vpack.c.bf16 %v38_v16, %v37_v15  ;;  %v40_v19 = vld [vmem:[#allocation2 + $0x28] sm:$0xff]  ;;  %v41_v21 = vld [vmem:[#allocation2 + $0x30] sm:$0xff]  ;;  %v42_v22 = vld [vmem:[#allocation2 + $0x38] sm:$0xff]  ;;  %s578_s10 = scalar_lea.vmem %s330_s1, 128  ;;  %p583_p9 = scmp.lt.s32.totalorder %s330_s1, %s330_s1 }
  0x18   :  { %471 = vmatprep.subr.bf16.mxu0 %v470_v6  ;;  %v482_v20 = vpack.c.bf16 %v40_v19, %v39_v17  ;;  %v486_v23 = vpack.c.bf16 %v42_v22, %v41_v21  ;;  %v43_v24 = vld [vmem:[#allocation2 + $0x40] sm:$0xff]  ;;  %v44_v25 = vld [vmem:[#allocation2 + $0x48] sm:$0xff]  ;;  %v45_v27 = vld [vmem:[#allocation2 + $0x50] sm:$0xff]  ;;  %p579_p8 = scmp.ne.s32.totalorder %s330_s1, %s578_s10  ;;  %p584_p10 = scmp.lt.s32.totalorder %s578_s10, %s578_s10 }
  0x19   :  { %475 = vmatprep.subr.bf16.mxu1 %v474_v14  ;;  %v490_v26 = vpack.c.bf16 %v44_v25, %v43_v24  ;;  %v46_v28 = vld [vmem:[#allocation2 + $0x58] sm:$0xff]  ;;  %v47_v30 = vld [vmem:[#allocation2 + $0x60] sm:$0xff]  ;;  %v48_v31 = vld [vmem:[#allocation2 + $0x68] sm:$0xff] }
  0x1a   :  { %477 = vmatpush3.bf16.msra.mxu1 %v474_v14  ;;  %v494_v29 = vpack.c.bf16 %v46_v28, %v45_v27  ;;  %v498_v32 = vpack.c.bf16 %v48_v31, %v47_v30  ;;  %v49_v33 = vld [vmem:[#allocation2 + $0x70] sm:$0xff]  ;;  %v50_v34 = vld [vmem:[#allocation2 + $0x78] sm:$0xff]  ;;  %p585_p11 = por %p584_p10, %p583_p9 }
  0x1b   :  { %473 = vmatpush3.bf16.msra.mxu0 %v470_v6  ;;  %479 = vmatprep.subr.bf16.mxu1 %v478_v18  ;;  %v502_v35 = vpack.c.bf16 %v50_v34, %v49_v33 }
  0x1c   :  { %507 = vmatprep.subr.bf16.mxu0 %v474_v14  ;;  %p586_p12 = pnand %p585_p11, %p579_p8 }
  0x1e   :  { %394 = vmatmul.mubr.msk.f32.vlgmr.msra.gmra.mrb[0].mxu0 %vm51_vm0, %v30_v7  ;;  %481 = vmatpush3.bf16.msra.mxu1 %v478_v18 }
  0x1f   :  { %509 = vmatpush3.bf16.msra.mxu0 %v474_v14  ;;  %483 = vmatprep.subr.bf16.mxu1 %v482_v20 }
  0x20   :  { %511 = vmatprep.subr.bf16.mxu0 %v478_v18 }
  0x22   :  { %485 = vmatpush3.bf16.msra.mxu1 %v482_v20 }
  0x23   :  { %513 = vmatpush3.bf16.msra.mxu0 %v478_v18  ;;  %487 = vmatprep.subr.bf16.mxu1 %v486_v23 }
  0x24   :  { %515 = vmatprep.subr.bf16.mxu0 %v482_v20 }
  0x26   :  { %489 = vmatpush3.bf16.msra.mxu1 %v486_v23 }
  0x27   :  { %517 = vmatpush3.bf16.msra.mxu0 %v482_v20  ;;  %491 = vmatprep.subr.bf16.mxu1 %v490_v26 }
  0x28   :  { %519 = vmatprep.subr.bf16.mxu0 %v486_v23 }
  0x2a   :  { %493 = vmatpush3.bf16.msra.mxu1 %v490_v26 }
  0x2b   :  { %521 = vmatpush3.bf16.msra.mxu0 %v486_v23  ;;  %495 = vmatprep.subr.bf16.mxu1 %v494_v29 }
  0x2c   :  { %523 = vmatprep.subr.bf16.mxu0 %v490_v26 }
  0x2e   :  { %497 = vmatpush3.bf16.msra.mxu1 %v494_v29 }
  0x2f   :  { %525 = vmatpush3.bf16.msra.mxu0 %v490_v26  ;;  %499 = vmatprep.subr.bf16.mxu1 %v498_v32 }
  0x30   :  { %527 = vmatprep.subr.bf16.mxu0 %v494_v29 }
  0x32   :  { %501 = vmatpush3.bf16.msra.mxu1 %v498_v32 }
  0x33   :  { %529 = vmatpush3.bf16.msra.mxu0 %v494_v29  ;;  %503 = vmatprep.subr.bf16.mxu1 %v502_v35 }
  0x34   :  { %531 = vmatprep.subr.bf16.mxu0 %v498_v32 }
  0x36   :  { %505 = vmatpush3.bf16.msra.mxu1 %v502_v35 }
  0x37   :  { %533 = vmatpush3.bf16.msra.mxu0 %v498_v32 }
  0x38   :  { %535 = vmatprep.subr.bf16.mxu0 %v502_v35 }
  0x3b   :  { %537 = vmatpush3.bf16.msra.mxu0 %v502_v35 }
  0xf1   :  { %v658_v8 = vpop.f32.mrb[0].mxu0 }
  0xf2   :  { %v660_v9 = vpop.f32.mrb[1].mxu0  ;;  %v134_v11 = vand.u32 2147483647, %v658_v8 }
  0xf3   :  { %v133_v10 = vand.u32 2147483647, %v660_v9 }
  0xf5   :  { %135 = vmax.xlane.f32.xlu0 %v133_v10 }
  0xf9   :  { %137 = vmax.xlane.f32.xlu0 %v134_v11 }
 0x182   :  { %v136_v36 = vpop.xlane.xlu0 %135 }
 0x183   :  { %542 = vrcp.f32 %v136_v36 }
 0x186   :  { %v138_v37 = vpop.xlane.xlu0 %137 }
 0x187   :  { %544 = vrcp.f32 %v138_v37 }
 0x18d   :  { %v543_v38 = vpop.eup %542 }
 0x18e   :  { %v140_v39 = vmul.f32 %v543_v38, %v660_v9 }
 0x190   :  { %v143_v40 = vmul.f32 5.5555553, %v140_v39 }
 0x191   :  { %v545_v41 = vpop.eup %544 }
 0x192   :  { %v145_v42 = vmul.f32 1.442695, %v143_v40  ;;  %v142_v43 = vmul.f32 %v545_v41, %v658_v8 }
 0x194   :  { %546 = vpow2.f32 %v145_v42  ;;  %v144_v44 = vmul.f32 5.5555553, %v142_v43 }
 0x196   :  { %v147_v45 = vmul.f32 1.442695, %v144_v44 }
 0x198   :  { %548 = vpow2.f32 %v147_v45 }
 0x19e   :  { %v547_v46 = vpop.eup %546 }
 0x19f   :  { %v340_v47 = vadd.f32 -1.0, %v547_v46 }
 0x1a1   :  { %v151_v48 = vmul.f32 0.0038809234, %v340_v47 }
 0x1a2   :  { %v549_v49 = vpop.eup %548 }
 0x1a3   :  { %428 = vmatprep.mubr.f32.mxu1 %v151_v48  ;;  %v341_v50 = vadd.f32 -1.0, %v549_v49 }
 0x1a5   :  { %v152_v51 = vmul.f32 0.0038809234, %v341_v50 }
 0x1a7   :  { %429 = vmatmul.mubr.f32.vlgmr.msra.gmra.mrb[0].mxu1 %v152_v51 }
 0x27a   :  { %v430_v52 = vpop.f32.mrb[0].mxu1 }
 0x27b   :  { %v219_v53 = vpop.f32.mrb[1].mxu1  ;;  %v229_v55 = vmul.f32 %v430_v52, %v152_v51 }
 0x27c   :  { %v228_v54 = vmul.f32 %v219_v53, %v151_v48 }
 0x27e   :  { %463 = vmatprep.mubr.f32.mxu0 %v228_v54 }
 0x27f   :  { %464 = vmatmul.mubr.f32.vlgmr.msra.gmra.mrb[2].mxu0 %v229_v55 }
 0x352   :  { %v465_v56 = vpop.f32.mrb[2].mxu0 }
 0x353   :  { %v296_v57 = vpop.f32.mrb[3].mxu0  ;;  %v306_v59 = vmul.f32 %v465_v56, %v152_v51 }
 0x354   :  { %v305_v58 = vmul.f32 %v296_v57, %v151_v48 }
 0x355   :  { %v308_v61 = vand.u32 2147483647, %v306_v59 }
 0x356   :  { %v307_v60 = vand.u32 2147483647, %v305_v58 }
 0x358   :  { %309 = vmax.xlane.f32.xlu1 %v307_v60 }
 0x35c   :  { %311 = vmax.xlane.f32.xlu1 %v308_v61 }
 0x3e5   :  { %v310_v62 = vpop.xlane.xlu1 %309 }
 0x3e6   :  { %550 = vrcp.f32 %v310_v62 }
 0x3e9   :  { %v312_v63 = vpop.xlane.xlu1 %311 }
 0x3ea   :  { %552 = vrcp.f32 %v312_v63 }
 0x3f0   :  { %v551_v0 = vpop.eup %550 }
 0x3f1   :  { %v314_v2 = vmul.f32 %v551_v0, %v305_v58 }
 0x3f4   :  { %v553_v1 = vpop.eup %552 }
 0x3f5   :  { %v316_v3 = vmul.f32 %v553_v1, %v306_v59 }
 0x3f7   :  { %v317_v4 = vadd.f32 %v316_v3, %v314_v2 }
 0x3f9   :  { %v342_v5 = vadd.f32 -0.11, %v317_v4 }
 0x3fb   :  { %v319_v6 = vmul.f32 0.5, %v342_v5 }
 0x3fd   :  { %554 = vtanh.f32 %v319_v6 }
 0x407   :  { %v555_v7 = vpop.eup %554 }
 0x408   :  { %v321_v8 = vmax.f32 %v555_v7, 0.0 }
 0x40a   :  { %322 = vst [vmem:[#allocation5] sm:$0xff] %v321_v8 }
 0x40b   :  { %589 = shalt.err (!%p586_p12)
}
 0x40c   :  { %s590_s13 = scalar_lea.hbm %s681_s3, 128 }
 0x40d   :  { %p591_p13 = scmp.ne.s32.totalorder %s681_s3, %s590_s13  ;;  %p594_p0 = scmp.lt.u32.totalorder %s590_s13, %s681_s3 }
 0x40f   :  { %p596_p1 = pnand %p594_p0, %p591_p13 }
 0x411   :  { %599 = shalt.err (!%p596_p1)
}
 0x412   :  { %332 = dma.vmem_to_hbm [thread:$0]  %s330_s1, 128, %s681_s3, [#allocation4]  }
 0x413   :  { %602 = dma.done.wait [#allocation4], 128  }
 0x414   :  { %603 = vsyncadd [#allocation4], 4294967168 }
 0x415   :  { %336 = vsyncpa [#allocation3], 1 }
 0x416   :  { %337 = vsyncpa [#allocation4], 1 }

</bundles_post_ra>
